<compile_context>
chip_gen: v7x
topology: tpu7x:2x2x1
jax: 0.10.0
libtpu: 0.0.40
codegen_flags: <defaults>
</compile_context>

<pallas_src>
import functools

import jax
import jax.numpy as jnp
from jax.experimental import pallas as pl
from jax.experimental.pallas import tpu as pltpu
import numpy as np


def _round_up(n, m):
    return ((n + m - 1) // m) * m


def _ffn_kernel(x_ref, w1_ref, b1_ref, w2_ref, b2_ref, o_ref, acc_ref):
    """One (row-tile, hidden-chunk) step of y = gelu(x @ W1 + b1) @ W2 + b2."""
    k = pl.program_id(1)

    @pl.when(k == 0)
    def _init():
        # Initialize the f32 accumulator with the second bias (broadcast over rows).
        acc_ref[...] = jnp.broadcast_to(
            b2_ref[...].astype(jnp.float32), acc_ref.shape
        )

    # First linear for this hidden chunk: (tm, dim_p)@(dim_p, hk) on bf16 MXU
    # operands, f32 accumulation.
    h = jnp.dot(x_ref[...], w1_ref[...], preferred_element_type=jnp.float32)
    h = h + b1_ref[...]  # bias kept f32
    # Exact GELU (PyTorch nn.GELU default, erf-based), kept in f32 on the VPU/EUP.
    h = 0.5 * h * (1.0 + jax.lax.erf(h * jnp.float32(0.7071067811865476)))
    # Dropout(p=0.0) is the identity.
    # Second linear partial sum: (tm, hk)@(hk, dim_p), accumulate into f32 scratch.
    acc_ref[...] += jnp.dot(
        h.astype(w2_ref.dtype), w2_ref[...], preferred_element_type=jnp.float32
    )

    @pl.when(k == pl.num_programs(1) - 1)
    def _store():
        o_ref[...] = acc_ref[...].astype(o_ref.dtype)


def prepare_ffn_params(w1, b1, w2, b2, hk_max=1024, compute_dtype=jnp.bfloat16):
    """Pad weights once (lane-dense, multiples of 128) and cast to the MXU dtype.

    Returns (w1_p, b1_p, w2_p, b2_p, hk). Zero-padding is exact for this FFN:
    gelu(0) = 0 and zero weight rows/cols contribute nothing.
    """
    dim, hidden = w1.shape
    dim_p = _round_up(dim, 128)
    hk = min(hk_max, _round_up(hidden, 128))   # hidden chunk per grid step
    hidden_p = _round_up(hidden, hk)

    w1_p = jnp.pad(w1, ((0, dim_p - dim), (0, hidden_p - hidden))).astype(compute_dtype)
    w2_p = jnp.pad(w2, ((0, hidden_p - hidden), (0, dim_p - dim))).astype(compute_dtype)
    # Biases stay f32 (tiny; keeps the bias add / GELU input exact).
    b1_p = jnp.pad(b1, ((0, 0), (0, hidden_p - hidden))).astype(jnp.float32)
    b2_p = jnp.pad(b2, ((0, 0), (0, dim_p - dim))).astype(jnp.float32)
    return w1_p, b1_p, w2_p, b2_p, hk


def ffn_pallas(x, w1_p, b1_p, w2_p, b2_p, *, hk, tm=256):
    """x: (..., dim) float32. Padded params from prepare_ffn_params.
    Returns same shape/dtype as x."""
    orig_shape = x.shape
    dim = orig_shape[-1]
    dim_p, hidden_p = w1_p.shape
    compute_dtype = w1_p.dtype

    x2d = x.reshape(-1, dim)
    M = x2d.shape[0]

    # Row tile: multiple of 8 (sublane). Guarantee >= 2 M-steps when M is small so
    # the "parallel" axis actually shards across v7x's two TensorCores.
    if M <= 2 * tm:
        tm = _round_up(max(1, -(-M // 2)), 8)
    else:
        tm = _round_up(tm, 8)
    tm = min(tm, _round_up(M, 8))
    m_p = _round_up(M, tm)

    # Pad/cast x only when needed (M tail and/or dim not a multiple of 128).
    x_c = x2d.astype(compute_dtype)
    if (m_p - M) or (dim_p - dim):
        x_c = jnp.pad(x_c, ((0, m_p - M), (0, dim_p - dim)))

    # VMEM budget: double-buffered x / W1-slab / W2-slab / out tiles + f32
    # accumulator + (tm, hk) f32 intermediate, with headroom; capped at the
    # chip's physical VMEM minus 8 MiB.
    bpe = jnp.dtype(compute_dtype).itemsize
    footprint = (
        2 * tm * dim_p * bpe          # x tile, double-buffered
        + 2 * dim_p * hk * bpe        # w1 slab, double-buffered
        + 2 * hk * 4                  # b1 slab
        + 2 * hk * dim_p * bpe        # w2 slab, double-buffered
        + 2 * dim_p * 4               # b2
        + 2 * tm * dim_p * 4          # out tile (f32), double-buffered
        + tm * dim_p * 4              # f32 accumulator scratch
        + tm * hk * 4                 # f32 GELU intermediate
    )
    try:
        vmem_cap = int(pltpu.get_tpu_info().vmem_capacity_bytes)
    except Exception:
        vmem_cap = 64 << 20  # conservative (v7x per-TC VMEM)
    vmem_bytes = int(1.3 * footprint) + (4 << 20)
    vmem_bytes = min(max(vmem_bytes, 32 << 20), vmem_cap - (8 << 20))

    n_k = hidden_p // hk
    grid = (m_p // tm, n_k)

    cost = pl.CostEstimate(
        flops=4 * m_p * dim_p * hidden_p,
        transcendentals=m_p * hidden_p,
        bytes_accessed=(
            m_p * dim_p * bpe                # x
            + dim_p * hidden_p * bpe * 2     # W1 + W2
            + (hidden_p + dim_p) * 4         # biases
            + m_p * dim_p * 4                # out
        ),
    )

    out = pl.pallas_call(
        _ffn_kernel,
        out_shape=jax.ShapeDtypeStruct((m_p, dim_p), x.dtype),
        grid_spec=pltpu.PrefetchScalarGridSpec(
            num_scalar_prefetch=0,
            grid=grid,
            in_specs=[
                pl.BlockSpec((tm, dim_p), lambda i, k: (i, 0)),   # x row tile
                pl.BlockSpec((dim_p, hk), lambda i, k: (0, k)),   # W1 column slab
                pl.BlockSpec((1, hk), lambda i, k: (0, k)),       # b1 chunk
                pl.BlockSpec((hk, dim_p), lambda i, k: (k, 0)),   # W2 row slab
                pl.BlockSpec((1, dim_p), lambda i, k: (0, 0)),    # b2 (constant)
            ],
            out_specs=pl.BlockSpec((tm, dim_p), lambda i, k: (i, 0)),
            scratch_shapes=[pltpu.VMEM((tm, dim_p), jnp.float32)],
        ),
        compiler_params=pltpu.CompilerParams(
            dimension_semantics=("parallel", "arbitrary"),
            vmem_limit_bytes=vmem_bytes,
        ),
        cost_estimate=cost,
    )(x_c, w1_p, b1_p, w2_p, b2_p)

    return out[:M, :dim].reshape(orig_shape)


def _init_params(key, dim, hidden_dim):
    """Deterministic init mimicking torch.nn.Linear defaults (uniform +/- 1/sqrt(fan_in))."""
    k1, k2, k3, k4 = jax.random.split(key, 4)
    bound1 = 1.0 / np.sqrt(dim)
    bound2 = 1.0 / np.sqrt(hidden_dim)
    w1 = jax.random.uniform(k1, (dim, hidden_dim), jnp.float32, -bound1, bound1)
    b1 = jax.random.uniform(k2, (1, hidden_dim), jnp.float32, -bound1, bound1)
    w2 = jax.random.uniform(k3, (hidden_dim, dim), jnp.float32, -bound2, bound2)
    b2 = jax.random.uniform(k4, (1, dim), jnp.float32, -bound2, bound2)
    return w1, b1, w2, b2


def _reference(x, w1, b1, w2, b2):
    h = x @ w1 + b1[0]
    h = 0.5 * h * (1.0 + jax.lax.erf(h / jnp.sqrt(2.0)))
    return h @ w2 + b2[0]


if __name__ == "__main__":
    batch, seq, dim, hidden_dim = 2, 8, 32, 64
    key = jax.random.PRNGKey(0)
    kx, kp = jax.random.split(key)

    x = jax.random.normal(kx, (batch, seq, dim), dtype=jnp.float32)
    w1, b1, w2, b2 = _init_params(kp, dim, hidden_dim)

    # One-time parameter preparation (padding + bf16 cast), off the hot path.
    w1_p, b1_p, w2_p, b2_p, hk = prepare_ffn_params(w1, b1, w2, b2)

    ffn = jax.jit(functools.partial(ffn_pallas, hk=hk))
    y = ffn(x, w1_p, b1_p, w2_p, b2_p)
    y = jax.block_until_ready(y)

    y_ref = _reference(x.reshape(-1, dim), w1, b1, w2, b2).reshape(x.shape)
    # bf16 MXU operands (f32 accumulation) -> ~1e-2 relative deviation vs the
    # f32 PyTorch-equivalent reference; tolerance relaxed accordingly.
    np.testing.assert_allclose(np.asarray(y), np.asarray(y_ref), rtol=2e-2, atol=2e-2)

    print("KERNEL_OK")
</pallas_src>

<mosaic_0001>
module attributes {stable_mosaic.version = 11 : i64} {
  func.func @_ffn_kernel(%arg0: i32, %arg1: i32, %arg2: memref<8x128xbf16, #tpu.memory_space<vmem>>, %arg3: memref<128x128xbf16, #tpu.memory_space<vmem>>, %arg4: memref<1x128xf32, #tpu.memory_space<vmem>>, %arg5: memref<128x128xbf16, #tpu.memory_space<vmem>>, %arg6: memref<1x128xf32, #tpu.memory_space<vmem>>, %arg7: memref<8x128xf32, #tpu.memory_space<vmem>>, %arg8: memref<8x128xf32, #tpu.memory_space<vmem>>) attributes {dimension_semantics = [#tpu.dimension_semantics<parallel>, #tpu.dimension_semantics<arbitrary>], iteration_bounds = array<i64: 2, 1>, scalar_prefetch = 0 : i64, scratch_operands = 1 : i64, tpu.core_type = #tpu.core_type<tc>, window_params = [{transform_indices = @transform_0, window_bounds = array<i64: 8, 128>}, {transform_indices = @transform_1, window_bounds = array<i64: 128, 128>}, {transform_indices = @transform_2, window_bounds = array<i64: 1, 128>}, {transform_indices = @transform_3, window_bounds = array<i64: 128, 128>}, {pipeline_mode = #tpu.pipeline_mode<synchronous>, transform_indices = @transform_4, window_bounds = array<i64: 1, 128>}, {transform_indices = @transform_5, window_bounds = array<i64: 8, 128>}]} {
    %c0_i32 = arith.constant 0 : i32
    %0 = arith.cmpi eq, %arg1, %c0_i32 : i32
    %1 = arith.extui %0 : i1 to i32
    %c0_i32_0 = arith.constant 0 : i32
    %2 = arith.cmpi ne, %1, %c0_i32_0 : i32
    scf.if %2 {
      %c0_18 = arith.constant 0 : index
      %c0_19 = arith.constant 0 : index
      %26 = vector.load %arg6[%c0_18, %c0_19] : memref<1x128xf32, #tpu.memory_space<vmem>>, vector<1x128xf32>
      %27 = vector.shape_cast %26 : vector<1x128xf32> to vector<1x128xf32>
      %28 = vector.broadcast %27 : vector<1x128xf32> to vector<8x128xf32>
      %c0_20 = arith.constant 0 : index
      %c0_21 = arith.constant 0 : index
      %29 = vector.load %arg8[%c0_20, %c0_21] : memref<8x128xf32, #tpu.memory_space<vmem>>, vector<8x128xf32>
      tpu.vector_store %arg8[%c0_20, %c0_21], %28 {strides = array<i32>} : memref<8x128xf32, #tpu.memory_space<vmem>>, vector<8x128xf32>,
    } else {
    }
    %c0 = arith.constant 0 : index
    %c0_1 = arith.constant 0 : index
    %3 = vector.load %arg2[%c0, %c0_1] : memref<8x128xbf16, #tpu.memory_space<vmem>>, vector<8x128xbf16>
    %c0_2 = arith.constant 0 : index
    %c0_3 = arith.constant 0 : index
    %4 = vector.load %arg3[%c0_2, %c0_3] : memref<128x128xbf16, #tpu.memory_space<vmem>>, vector<128x128xbf16>
    %cst = arith.constant dense<0.000000e+00> : vector<8x128xf32>
    %5 = tpu.matmul %3, %4, %cst {dimension_numbers = #tpu.dot_dimension_numbers<[1], [0], [0], [1], [0, 0, 1, 1], [], []>} : vector<8x128xbf16>, vector<128x128xbf16>, vector<8x128xf32> -> vector<8x128xf32>
    %c0_4 = arith.constant 0 : index
    %c0_5 = arith.constant 0 : index
    %6 = vector.load %arg4[%c0_4, %c0_5] : memref<1x128xf32, #tpu.memory_space<vmem>>, vector<1x128xf32>
    %7 = vector.broadcast %6 : vector<1x128xf32> to vector<8x128xf32>
    %8 = arith.addf %5, %7 : vector<8x128xf32>
    %cst_6 = arith.constant 5.000000e-01 : f32
    %9 = vector.broadcast %cst_6 : f32 to vector<8x128xf32>
    %10 = arith.mulf %9, %8 : vector<8x128xf32>
    %cst_7 = arith.constant 0.707106769 : f32
    %11 = vector.broadcast %cst_7 : f32 to vector<8x128xf32>
    %12 = arith.mulf %8, %11 : vector<8x128xf32>
    %13 = math.erf %12 : vector<8x128xf32>
    %cst_8 = arith.constant 1.000000e+00 : f32
    %14 = vector.broadcast %cst_8 : f32 to vector<8x128xf32>
    %15 = arith.addf %14, %13 : vector<8x128xf32>
    %16 = arith.mulf %10, %15 : vector<8x128xf32>
    %c0_9 = arith.constant 0 : index
    %c0_10 = arith.constant 0 : index
    %17 = vector.load %arg8[%c0_9, %c0_10] : memref<8x128xf32, #tpu.memory_space<vmem>>, vector<8x128xf32>
    %18 = arith.truncf %16 : vector<8x128xf32> to vector<8x128xbf16>
    %c0_11 = arith.constant 0 : index
    %c0_12 = arith.constant 0 : index
    %19 = vector.load %arg5[%c0_11, %c0_12] : memref<128x128xbf16, #tpu.memory_space<vmem>>, vector<128x128xbf16>
    %cst_13 = arith.constant dense<0.000000e+00> : vector<8x128xf32>
    %20 = tpu.matmul %18, %19, %cst_13 {dimension_numbers = #tpu.dot_dimension_numbers<[1], [0], [0], [1], [0, 0, 1, 1], [], []>} : vector<8x128xbf16>, vector<128x128xbf16>, vector<8x128xf32> -> vector<8x128xf32>
    %21 = arith.addf %17, %20 : vector<8x128xf32>
    %c0_14 = arith.constant 0 : index
    %c0_15 = arith.constant 0 : index
    %22 = vector.load %arg8[%c0_14, %c0_15] : memref<8x128xf32, #tpu.memory_space<vmem>>, vector<8x128xf32>
    tpu.vector_store %arg8[%c0_14, %c0_15], %21 {strides = array<i32>} : memref<8x128xf32, #tpu.memory_space<vmem>>, vector<8x128xf32>,
    %c0_i32_16 = arith.constant 0 : i32
    %23 = arith.cmpi eq, %arg1, %c0_i32_16 : i32
    %24 = arith.extui %23 : i1 to i32
    %c0_i32_17 = arith.constant 0 : i32
    %25 = arith.cmpi ne, %24, %c0_i32_17 : i32
    scf.if %25 {
      %c0_18 = arith.constant 0 : index
      %c0_19 = arith.constant 0 : index
      %26 = vector.load %arg8[%c0_18, %c0_19] : memref<8x128xf32, #tpu.memory_space<vmem>>, vector<8x128xf32>
      %c0_20 = arith.constant 0 : index
      %c0_21 = arith.constant 0 : index
      %27 = vector.load %arg7[%c0_20, %c0_21] : memref<8x128xf32, #tpu.memory_space<vmem>>, vector<8x128xf32>
      tpu.vector_store %arg7[%c0_20, %c0_21], %26 {strides = array<i32>} : memref<8x128xf32, #tpu.memory_space<vmem>>, vector<8x128xf32>,
    } else {
    }
    return
  }
  func.func @transform_0(%arg0: i32, %arg1: i32) -> (i32, i32) {
    %c0_i32 = arith.constant 0 : i32
    %c0_i32_0 = arith.constant 0 : i32
    return %arg0, %c0_i32 : i32, i32
  }
  func.func @transform_1(%arg0: i32, %arg1: i32) -> (i32, i32) {
    %c0_i32 = arith.constant 0 : i32
    %c0_i32_0 = arith.constant 0 : i32
    return %c0_i32, %arg1 : i32, i32
  }
  func.func @transform_2(%arg0: i32, %arg1: i32) -> (i32, i32) {
    %c0_i32 = arith.constant 0 : i32
    %c0_i32_0 = arith.constant 0 : i32
    return %c0_i32, %arg1 : i32, i32
  }
  func.func @transform_3(%arg0: i32, %arg1: i32) -> (i32, i32) {
    %c0_i32 = arith.constant 0 : i32
    %c0_i32_0 = arith.constant 0 : i32
    return %arg1, %c0_i32 : i32, i32
  }
  func.func @transform_4(%arg0: i32, %arg1: i32) -> (i32, i32) {
    %c0_i32 = arith.constant 0 : i32
    %c0_i32_0 = arith.constant 0 : i32
    %c0_i32_1 = arith.constant 0 : i32
    return %c0_i32, %c0_i32_0 : i32, i32
  }
  func.func @transform_5(%arg0: i32, %arg1: i32) -> (i32, i32) {
    %c0_i32 = arith.constant 0 : i32
    %c0_i32_0 = arith.constant 0 : i32
    return %arg0, %c0_i32 : i32, i32
  }
}

</mosaic_0001>

<bundles_post_ra>
// kernel: ffn_pallas.1
= control target key start
LH: loop header
LB: loop body
LE: loop exit
PB: predicated region body
PF: predicated region fallthrough
CT: control target
= control target key end

     0   :  { %10 = vsyncpa [#allocation4], 0  ;;  %s1039_s0 = inlined_call_operand.vmem [shape: bf16[16,128], index: 0, kind: input, shape index: {}]   ;;  %s1040_s1 = inlined_call_operand.hbm [shape: bf16[128,128], index: 1, kind: input, shape index: {}]   ;;  %s1041_s2 = inlined_call_operand.vmem [shape: f32[1,128], index: 2, kind: input, shape index: {}]   ;;  %s1042_s3 = inlined_call_operand.hbm [shape: bf16[128,128], index: 3, kind: input, shape index: {}]   ;;  %s1043_s4 = inlined_call_operand.vmem [shape: f32[1,128], index: 4, kind: input, shape index: {}]   ;;  %s1044_s5 = inlined_call_operand.vmem [shape: f32[16,128], index: 5, kind: output, shape index: {}]  }
   0x1   :  { %11 = vsyncpa [#allocation6], 0  ;;  %s916_s18 = smov 0   ;;  %s918_s19 = smov 0  }
   0x2   :  { %s920_s20 = smov 0  }
   0x3 LB: > { %s635_s21 = sadd.s32 4294967295, %s878_s20   ;;  %s29_s22 = sadd.s32 1, %s874_s19  ;;  %s878_s20 = sphi %s920_s20, %s17_s20   ;;  %s874_s19 = sphi %s918_s19, %s1054_s19   ;;  %s870_s18 = sphi %s916_s18, %s1053_s18  }
   0x4   : > { %p31_p0 = scmp.ge.s32.totalorder %s29_s22, 2  ;;  %p637_p1 = scmp.ge.s32.totalorder %s878_s20, 1 }
   0x5   : > { %p185_p2 = scmp.lt.s32.totalorder %s878_s20, 3  ;;  %p941_p4 = scmp.eq.s32.totalorder %s635_s21, 0 }
   0x6   : > { %s1056_s22 = smov (%p31_p0, %s29_s22), 0  ;;  %s880_s25 = smov [#allocation3]  }
   0x7   : > { %p937_p3 = pnand %p637_p1, %p185_p2  ;;  %s199_s26 = sshll.u32 %s880_s25, 4  ;;  %s200_s26 = int_to_ptr.vmem [resolvable:$true] %s199_s26 }
   0x8   : > { %s1049_s24 = scalar_select %p941_p4, 1, 0 }
   0x9   : > { %s1048_s23 = scalar_select %p937_p3, 1, 0 }
   0xa   : > { %p733_p5 = pneg %p937_p3  ;;  %s881_s28 = smov [#allocation5]  }
   0xb   : > { %s221_s29 = sshll.u32 %s881_s28, 4  ;;  %s792_s7 = scalar_lea.hbm %s1040_s1, 1024  ;;  %s953_s29 = int_to_ptr.vmem [resolvable:$true] %s221_s29 }
   0xc   : > { %p949_p6 = pnand %p941_p4, %p733_p5  ;;  %p793_p7 = scmp.ne.s32.totalorder %s1040_s1, %s792_s7 }
   0xd   : > { %p799_p11 = scmp.lt.u32.totalorder %s792_s7, %s1040_s1 }
   0xe   : > { %p794_p8 = pneg %p949_p6 }
  0x10   : > { %p795_p9 = pnand %p794_p8, %p793_p7 }
  0x12   : > { %p796_p10 = pneg %p795_p9 }
  0x14   : > { %p801_p12 = pnand %p799_p11, %p796_p10 }
  0x16   : > { %804 = shalt.err (!%p801_p12)
}
  0x17   : > { %s805_s12 = scalar_lea.vmem %s200_s26, 1024  ;;  %p813_p2 = scmp.lt.s32.totalorder %s200_s26, %s200_s26 }
  0x18   : > { %p806_p13 = scmp.ne.s32.totalorder %s200_s26, %s805_s12  ;;  %p814_p5 = scmp.lt.s32.totalorder %s805_s12, %s805_s12 }
  0x1a   : > { %p808_p0 = pnand %p806_p13, %p794_p8  ;;  %p815_p4 = por %p814_p5, %p813_p2 }
  0x1c   : > { %p809_p1 = pneg %p808_p0 }
  0x1e   : > { %p816_p3 = pnand %p815_p4, %p809_p1 }
  0x20   : > { %819 = shalt.err (!%p816_p3)
}
  0x21   : > { %s882_s13 = smov 64   ;;  %s883_s14 = smov 4  }
  0x22   : > { %736 = dma.hbm_to_vmem [thread:$0]  (!%p949_p6), %s1040_s1, 1024, %s200_s26, [#allocation4], %s882_s13, %s882_s13, %s883_s14  }
  0x23   : > { %s820_s25 = scalar_lea.hbm %s1042_s3, 1024 }
  0x24   : > { %p821_p7 = scmp.ne.s32.totalorder %s1042_s3, %s820_s25  ;;  %p827_p9 = scmp.lt.u32.totalorder %s820_s25, %s1042_s3 }
  0x26   : > { %p823_p3 = pnand %p821_p7, %p794_p8 }
  0x28   : > { %p824_p4 = pneg %p823_p3 }
  0x2a   : > { %p829_p10 = pnand %p827_p9, %p824_p4 }
  0x2c   : > { %832 = shalt.err (!%p829_p10)
}
  0x2d   : > { %s833_s26 = scalar_lea.vmem %s953_s29, 1024  ;;  %p841_p0 = scmp.lt.s32.totalorder %s953_s29, %s953_s29 }
  0x2e   : > { %p834_p11 = scmp.ne.s32.totalorder %s953_s29, %s833_s26  ;;  %p842_p1 = scmp.lt.s32.totalorder %s833_s26, %s833_s26 }
  0x30   : > { %p836_p12 = pnand %p834_p11, %p794_p8  ;;  %p843_p2 = por %p842_p1, %p841_p0 }
  0x32   : > { %p837_p13 = pneg %p836_p12 }
  0x34   : > { %p844_p5 = pnand %p843_p2, %p837_p13 }
  0x36   : > { %847 = shalt.err (!%p844_p5)
}
  0x37   : > { %739 = dma.hbm_to_vmem [thread:$0]  (!%p949_p6), %s1042_s3, 1024, %s953_s29, [#allocation6], %s882_s13, %s882_s13, %s883_s14  }
  0x38   : > { %p1051_p7 = scmp.ne.s32.totalorder %s1048_s23, 0 }
  0x39   : > { %p1052_p3 = scmp.ne.s32.totalorder (!%p1051_p7), %s1049_s24, 0 }
  0x3a   : > { %247 = sbr.rel (%p1051_p7) target bundleno = 550 (0x226), region = 40 }
  0x41   : > { %861 = dma.done.wait (%p1052_p3), [#allocation4], 1024  }
  0x42   : > { %863 = vsyncadd (%p1052_p3), [#allocation4], 4294966272 }
  0x43   : > { %865 = dma.done.wait (%p1052_p3), [#allocation6], 1024  }
  0x44   : > { %867 = vsyncadd (%p1052_p3), [#allocation6], 4294966272  ;;  %v884_v0 = vmov 0.0   ;;  %vm885_vm0 = vmmov 0   ;;  %v774_v1 = vld [vmem:[#allocation3] sm:$0xff]   ;;  %v775_v2 = vld [vmem:[#allocation3 + $0x8] sm:$0xff]  }
  0x45   : > { %685 = vmatprep.subr.bf16.mxu0 %v884_v0  ;;  %701 = vmatprep.mubr.msk.bf16.mxu0 %vm885_vm0, %v884_v0  ;;  %v776_v3 = vld [vmem:[#allocation3 + $0x10] sm:$0xff]   ;;  %v782_v4 = vld [vmem:[#allocation5] sm:$0xff]   ;;  %v777_v5 = vld [vmem:[#allocation3 + $0x18] sm:$0xff]   ;;  %p280_p6 = scmp.lt.s32.totalorder %s870_s18, 1 }
  0x46   : > { %705 = vmatprep.subr.bf16.mxu1 %v884_v0  ;;  %721 = vmatprep.mubr.msk.bf16.mxu1 %vm885_vm0, %v884_v0  ;;  %v783_v6 = vld [vmem:[#allocation5 + $0x8] sm:$0xff]   ;;  %v778_v7 = vld [vmem:[#allocation3 + $0x20] sm:$0xff]   ;;  %v784_v8 = vld [vmem:[#allocation5 + $0x10] sm:$0xff]  }
  0x47   : > { %686 = vmatpush3.bf16.msra.mxu0 %v774_v1  ;;  %706 = vmatpush3.bf16.msra.mxu1 %v782_v4  ;;  %v779_v9 = vld [vmem:[#allocation3 + $0x28] sm:$0xff]   ;;  %s1058_s18 = smov (!%p280_p6, %s870_s18), 1  ;;  %v780_v10 = vld [vmem:[#allocation3 + $0x30] sm:$0xff]   ;;  %v781_v11 = vld [vmem:[#allocation3 + $0x38] sm:$0xff]  }
  0x48   : > { %687 = vmatprep.subr.bf16.mxu0 %v884_v0  ;;  %707 = vmatprep.subr.bf16.mxu1 %v884_v0  ;;  %s645_s23 = sshll.u32 %s1058_s18, 2  ;;  %v785_v13 = vld [vmem:[#allocation5 + $0x18] sm:$0xff]   ;;  %v786_v14 = vld [vmem:[#allocation5 + $0x20] sm:$0xff]   ;;  %v787_v15 = vld [vmem:[#allocation5 + $0x28] sm:$0xff]   ;;  %s646_s12 = sshll.u32 %s1058_s18, 3 }
  0x49   : > { %s283_s29 = scalar_lea.vmem %s1039_s0, %s645_s23  ;;  %v788_v16 = vld [vmem:[#allocation5 + $0x30] sm:$0xff]   ;;  %v789_v17 = vld [vmem:[#allocation5 + $0x38] sm:$0xff]   ;;  %v648_v18 = vld [vmem:[%s1041_s2] ss:$0 sm:$0xff]  ;;  %s291_s17 = scalar_lea.vmem %s1044_s5, %s646_s12 }
  0x4a   : > { %v305_v12 = vld [vmem:[%s283_s29] sm:$0xf] }
  0x4b   : > { %688 = vmatpush3.bf16.msra.mxu0 %v775_v2  ;;  %708 = vmatpush3.bf16.msra.mxu1 %v783_v6  ;;  %v647_v30 = vld [vmem:[%s1043_s4] ss:$0 sm:$0xff] }
  0x4c   : > { %689 = vmatprep.subr.bf16.mxu0 %v884_v0  ;;  %709 = vmatprep.subr.bf16.mxu1 %v884_v0 }
  0x4f   : > { %690 = vmatpush3.bf16.msra.mxu0 %v776_v3  ;;  %710 = vmatpush3.bf16.msra.mxu1 %v784_v8 }
  0x50   : > { %691 = vmatprep.subr.bf16.mxu0 %v884_v0  ;;  %711 = vmatprep.subr.bf16.mxu1 %v884_v0 }
  0x53   : > { %692 = vmatpush3.bf16.msra.mxu0 %v777_v5  ;;  %712 = vmatpush3.bf16.msra.mxu1 %v785_v13 }
  0x54   : > { %693 = vmatprep.subr.bf16.mxu0 %v884_v0  ;;  %713 = vmatprep.subr.bf16.mxu1 %v884_v0 }
  0x57   : > { %694 = vmatpush3.bf16.msra.mxu0 %v778_v7  ;;  %714 = vmatpush3.bf16.msra.mxu1 %v786_v14 }
  0x58   : > { %695 = vmatprep.subr.bf16.mxu0 %v884_v0  ;;  %715 = vmatprep.subr.bf16.mxu1 %v884_v0 }
  0x5b   : > { %696 = vmatpush3.bf16.msra.mxu0 %v779_v9  ;;  %716 = vmatpush3.bf16.msra.mxu1 %v787_v15 }
  0x5c   : > { %697 = vmatprep.subr.bf16.mxu0 %v884_v0  ;;  %717 = vmatprep.subr.bf16.mxu1 %v884_v0 }
  0x5f   : > { %698 = vmatpush3.bf16.msra.mxu0 %v780_v10  ;;  %718 = vmatpush3.bf16.msra.mxu1 %v788_v16 }
  0x60   : > { %699 = vmatprep.subr.bf16.mxu0 %v884_v0  ;;  %719 = vmatprep.subr.bf16.mxu1 %v884_v0 }
  0x63   : > { %700 = vmatpush3.bf16.msra.mxu0 %v781_v11  ;;  %720 = vmatpush3.bf16.msra.mxu1 %v789_v17 }
  0x66   : > { %702 = vmatmul.mubr.bf16.vlgmr.msra.gmra.mrb[0].mxu0 %v305_v12 }
 0x139   : > { %v411_v19 = vpop.f32.mrb[0].mxu0 }
 0x13a   : > { %v412_v20 = vadd.f32 %v648_v18, %v411_v19  ;;  %v703_v21 = vpop.f32.mrb[1].mxu0 }
 0x13b   : > { %v414_v22 = vpop.f32.mrb[2].mxu0 }
 0x13c   : > { %v418_v23 = vmul.f32 0.70710677, %v412_v20  ;;  %v704_v24 = vpop.f32.mrb[3].mxu0  ;;  %v417_v26 = vmul.f32 0.5, %v412_v20 }
 0x13e   : > { %790 = verf.f32 %v418_v23 }
 0x148   : > { %v791_v25 = vpop.eup %790 }
 0x149   : > { %v420_v27 = vadd.f32 1.0, %v791_v25 }
 0x14b   : > { %v421_v28 = vmul.f32 %v420_v27, %v417_v26 }
 0x14d   : > { %v423_v29 = vpack.c.bf16 %v421_v28, %v421_v28 }
 0x14f   : > { %722 = vmatmul.mubr.bf16.vlgmr.msra.gmra.mrb[0].mxu1 %v423_v29 }
 0x222   : > { %v522_v31 = vpop.f32.mrb[0].mxu1 }
 0x223   : > { %v528_v32 = vadd.f32 %v647_v30, %v522_v31  ;;  %v723_v33 = vpop.f32.mrb[1].mxu1 }
 0x224   : > { %v525_v34 = vpop.f32.mrb[2].mxu1 }
 0x225   : > { %534 = vst [vmem:[%s291_s17] sm:$0xff] %v528_v32  ;;  %v724_v35 = vpop.f32.mrb[3].mxu1 }
 0x226 PF: > { %s17_s20 = sadd.s32 1, %s878_s20   ;;  %s1053_s18 = smov %s874_s19 }
 0x227   : > { %p14_p8 = scmp.ge.s32.totalorder %s17_s20, 4   ;;  %s1054_s19 = smov %s1056_s22 }
 0x229   :  { %16 = sbr.rel (!%p14_p8) target bundleno = 3 (0x3), region = 92 }
 0x230   :  { %554 = vsyncpa [#allocation4], 1 }
 0x231   :  { %556 = vsyncpa [#allocation4 + $0x1], 1 }
 0x232   :  { %557 = vsyncpa [#allocation6], 1 }

</bundles_post_ra>
